<compile_context>
chip_gen: v7x
topology: tpu7x:2x2x1
jax: 0.10.0
libtpu: 0.0.40
codegen_flags: <defaults>
</compile_context>

<pallas_src>
import functools
import numpy as np
import jax
import jax.numpy as jnp
from jax.experimental import pallas as pl
from jax.experimental.pallas import tpu as pltpu


LANE = 128       # TPU lane width: feature / hidden dims padded to this
SUBLANE = 8      # sublane granularity for row tiles


def _round_up(x, m):
    return (x + m - 1) // m * m


# ----------------------------------------------------------------------------
# Schedule (numpy, mirrors the torch buffers registered in __init__)
# ----------------------------------------------------------------------------
def cosine_beta_schedule(timesteps, s=0.008, tau=1.0):
    steps = timesteps + 1
    x = np.linspace(0, timesteps, steps, dtype=np.float64)
    alphas_cumprod = np.cos(((x / timesteps) + s) / (1 + s) * np.pi * 0.5) ** (2.0 * tau)
    alphas_cumprod = alphas_cumprod / alphas_cumprod[0]
    betas = 1.0 - (alphas_cumprod[1:] / alphas_cumprod[:-1])
    return np.clip(betas, 0.0, 0.999)


def apply_conditioning(x, cond, observation_dim):
    # x[:, t, :observation_dim] = val   (functional update in JAX)
    for t_idx, val in cond.items():
        x = x.at[:, t_idx, :observation_dim].set(val)
    return x


def timestep_embedding_table(n_timesteps, dim):
    half = dim // 2
    freqs = np.exp(-np.log(10000.0) * np.arange(half) / half)
    args = np.arange(n_timesteps)[:, None].astype(np.float64) * freqs[None, :]
    return np.concatenate([np.sin(args), np.cos(args)], axis=-1).astype(np.float32)


# ----------------------------------------------------------------------------
# Fused reverse-diffusion kernel: grid = (row_tiles, n_timesteps)
#   step s (last grid axis) corresponds to diffusion timestep t = n_timesteps - 1 - s
# ----------------------------------------------------------------------------
def reverse_diffusion_kernel(coef_ref,                                 # SMEM (5, T)
                             x0_ref, hstat_ref, htemb_ref,             # VMEM inputs
                             w1x_ref, w2_ref, b2_ref,
                             noise_ref, mask_ref, vals_ref,
                             x_ref,                                    # VMEM output (resident state)
                             *, clip_denoised, predict_epsilon):
    n_steps = pl.num_programs(1)
    s = pl.program_id(1)
    t = n_steps - 1 - s                        # diffusion timestep (reversed sweep)

    @pl.when(s == 0)
    def _():
        # x ~ N(0, I) with conditioning applied (prepared on host), loaded once per row tile.
        x_ref[...] = x0_ref[...]

    x = x_ref[...]

    # ---- synthetic denoiser (two-layer MLP w/ SiLU) on the MXU: bf16 inputs, f32 accumulation
    h = jnp.dot(x.astype(jnp.bfloat16), w1x_ref[...],
                preferred_element_type=jnp.float32)
    h = h + hstat_ref[...] + htemb_ref[0]              # + act@W1a + b1 + temb[t]@W1t
    h = h * jax.nn.sigmoid(h)                          # SiLU
    pred = jnp.dot(h.astype(jnp.bfloat16), w2_ref[...],
                   preferred_element_type=jnp.float32) + b2_ref[...]

    # ---- per-timestep schedule scalars from the SMEM table
    c_recip = coef_ref[0, t]       # sqrt_recip_alphas_cumprod[t]
    c_recipm1 = coef_ref[1, t]     # sqrt_recipm1_alphas_cumprod[t]
    post_c1 = coef_ref[2, t]       # posterior_mean_coef1[t]
    post_c2 = coef_ref[3, t]       # posterior_mean_coef2[t]
    noise_scale = coef_ref[4, t]   # (t > 0) * exp(0.5 * posterior_log_variance_clipped[t])

    # predict_start_from_noise
    if predict_epsilon:
        x_recon = c_recip * x - c_recipm1 * pred
    else:
        x_recon = pred
    if clip_denoised:
        x_recon = jnp.clip(x_recon, -1.0, 1.0)

    # q_posterior mean + reparameterized sample (default_sample_fn); noise stream is pipelined in
    mean = post_c1 * x_recon + post_c2 * x
    x_new = mean + noise_scale * noise_ref[0]

    # apply_conditioning after every step (mask also zeroes padded rows / lanes)
    x_ref[...] = jnp.where(mask_ref[...] > 0.5, vals_ref[...], x_new)


def _run_reverse_loop(coefs, x0, hstat, htemb, w1x, w2, b2, noise, mask, vals,
                      *, n_timesteps, row_tile, clip_denoised, predict_epsilon):
    rows_pad, feat_pad = x0.shape
    hid_pad = w1x.shape[1]
    grid = (rows_pad // row_tile, n_timesteps)

    row_spec = pl.BlockSpec((row_tile, feat_pad), lambda r, s: (r, 0))
    smem_spec = pl.BlockSpec(memory_space=pltpu.MemorySpace.SMEM)

    kernel = functools.partial(reverse_diffusion_kernel,
                               clip_denoised=clip_denoised,
                               predict_epsilon=predict_epsilon)

    return pl.pallas_call(
        kernel,
        out_shape=jax.ShapeDtypeStruct((rows_pad, feat_pad), jnp.float32),
        grid=grid,
        in_specs=[
            smem_spec,                                                       # coef table (5, T)
            row_spec,                                                        # x0
            pl.BlockSpec((row_tile, hid_pad), lambda r, s: (r, 0)),          # act@W1a + b1
            pl.BlockSpec((1, 1, hid_pad),                                    # temb[t]@W1t
                         lambda r, s: (n_timesteps - 1 - s, 0, 0)),
            pl.BlockSpec((feat_pad, hid_pad), lambda r, s: (0, 0)),          # W1x (resident)
            pl.BlockSpec((hid_pad, feat_pad), lambda r, s: (0, 0)),          # W2  (resident)
            pl.BlockSpec((1, feat_pad), lambda r, s: (0, 0)),                # b2  (resident)
            pl.BlockSpec((1, row_tile, feat_pad),                            # noise[t] (streamed)
                         lambda r, s: (n_timesteps - 1 - s, r, 0)),
            row_spec,                                                        # conditioning mask
            row_spec,                                                        # conditioning values
        ],
        out_specs=row_spec,   # same block for every timestep -> VMEM-resident x state
        compiler_params=pltpu.CompilerParams(
            dimension_semantics=("parallel", "arbitrary")),
    )(coefs, x0, hstat, htemb, w1x, w2, b2, noise, mask, vals)


# ----------------------------------------------------------------------------
# GaussianDiffusion (sampling forward pass)
# ----------------------------------------------------------------------------
class GaussianDiffusionPallas:
    def __init__(self, horizon, observation_dim, action_dim, n_timesteps=1000,
                 clip_denoised=False, predict_epsilon=True, noise_sched_tau=1.0,
                 action_condition_noise_scale=1.0, hidden_dim=32, time_emb_dim=16, seed=0):
        self.horizon = horizon
        self.observation_dim = observation_dim
        self.action_dim = action_dim
        self.transition_dim = observation_dim + 2
        self.n_timesteps = int(n_timesteps)
        self.clip_denoised = clip_denoised
        self.predict_epsilon = predict_epsilon
        self.action_condition_noise_scale = action_condition_noise_scale
        self.hidden_dim = hidden_dim
        self.time_emb_dim = time_emb_dim

        # ---- schedule buffers (identical math to the torch register_buffer block)
        betas = cosine_beta_schedule(n_timesteps, tau=noise_sched_tau)
        alphas = 1.0 - betas
        alphas_cumprod = np.cumprod(alphas, axis=0)
        alphas_cumprod_prev = np.concatenate([np.ones(1), alphas_cumprod[:-1]])

        self.betas = betas
        self.alphas_cumprod = alphas_cumprod
        self.sqrt_alphas_cumprod = np.sqrt(alphas_cumprod)
        self.sqrt_one_minus_alphas_cumprod = np.sqrt(1.0 - alphas_cumprod)
        self.sqrt_recip_alphas_cumprod = np.sqrt(1.0 / alphas_cumprod)
        self.sqrt_recipm1_alphas_cumprod = np.sqrt(1.0 / alphas_cumprod - 1.0)
        posterior_variance = betas * (1.0 - alphas_cumprod_prev) / (1.0 - alphas_cumprod)
        self.posterior_variance = posterior_variance
        self.posterior_log_variance_clipped = np.log(np.clip(posterior_variance, 1e-20, None))
        self.posterior_mean_coef1 = betas * np.sqrt(alphas_cumprod_prev) / (1.0 - alphas_cumprod)
        self.posterior_mean_coef2 = (1.0 - alphas_cumprod_prev) * np.sqrt(alphas) / (1.0 - alphas_cumprod)

        # (5, n_timesteps) device coefficient table (long axis last -> SMEM friendly)
        nonzero = (np.arange(n_timesteps) > 0).astype(np.float64)
        noise_scale = nonzero * np.exp(0.5 * self.posterior_log_variance_clipped)
        self.coef_table = jnp.asarray(np.stack([
            self.sqrt_recip_alphas_cumprod,
            self.sqrt_recipm1_alphas_cumprod,
            self.posterior_mean_coef1,
            self.posterior_mean_coef2,
            noise_scale,
        ]).astype(np.float32))

        # ---- deterministic synthetic denoiser weights (torch takes `model` externally)
        #      pred = SiLU([x, act, temb] @ W1 + b1) @ W2 + b2, split into x / act / time blocks
        d_x, d_a, d_t = self.transition_dim, action_dim, time_emb_dim
        k1, k2 = jax.random.split(jax.random.PRNGKey(seed))
        w1 = np.asarray(jax.random.normal(k1, (d_x + d_a + d_t, hidden_dim), jnp.float32)) * 0.1
        w2 = np.asarray(jax.random.normal(k2, (hidden_dim, self.transition_dim), jnp.float32)) * 0.1
        b1 = np.zeros((hidden_dim,), np.float32)
        b2 = np.zeros((self.transition_dim,), np.float32)
        self.w1_act = jnp.asarray(w1[d_x:d_x + d_a])          # (action_dim, hidden), used once on host
        self.b1 = jnp.asarray(b1)

        self.feat_pad = _round_up(self.transition_dim, LANE)
        self.hid_pad = _round_up(hidden_dim, LANE)

        w1x_p = np.zeros((self.feat_pad, self.hid_pad), np.float32)
        w1x_p[:d_x, :hidden_dim] = w1[:d_x]
        w2_p = np.zeros((self.hid_pad, self.feat_pad), np.float32)
        w2_p[:hidden_dim, :self.transition_dim] = w2
        b2_p = np.zeros((1, self.feat_pad), np.float32)
        b2_p[0, :self.transition_dim] = b2
        self.w1x_pad = jnp.asarray(w1x_p, jnp.bfloat16)        # bf16 MXU inputs
        self.w2_pad = jnp.asarray(w2_p, jnp.bfloat16)
        self.b2_pad = jnp.asarray(b2_p)

        # per-timestep time-embedding contribution: temb[t] @ W1t  ->  (T, 1, hid_pad)
        temb = timestep_embedding_table(n_timesteps, time_emb_dim)
        ht = temb @ w1[d_x + d_a:]
        ht_p = np.zeros((n_timesteps, 1, self.hid_pad), np.float32)
        ht_p[:, 0, :hidden_dim] = ht
        self.h_temb_table = jnp.asarray(ht_p)

    def p_sample_loop(self, shape, cond, act=None, key=None, return_sequence=False):
        B, H, Tdim = shape
        assert Tdim == self.transition_dim
        key = jax.random.PRNGKey(1) if key is None else key
        key, k_x, k_noise = jax.random.split(key, 3)

        # initial x ~ N(0, I), conditioned (matches the torch loop preamble)
        x = jax.random.normal(k_x, shape, jnp.float32)
        x = apply_conditioning(x, cond, self.observation_dim)

        rows = B * H
        row_tile = min(256, _round_up(rows, SUBLANE))      # keeps VMEM small on v7x; "parallel" axis
        rows_pad = _round_up(rows, row_tile)

        # pad trajectory to (rows_pad, feat_pad): lane-dense loads / unmasked stores
        x0 = jnp.zeros((rows_pad, self.feat_pad), jnp.float32)
        x0 = x0.at[:rows, :Tdim].set(x.reshape(rows, Tdim))

        # hoisted (step-invariant) denoiser contribution: act @ W1a + b1
        if act is None:
            act = jnp.zeros((B, H, self.action_dim), jnp.float32)
        h_static = act.reshape(rows, self.action_dim).astype(jnp.float32) @ self.w1_act + self.b1
        hstat = jnp.zeros((rows_pad, self.hid_pad), jnp.float32)
        hstat = hstat.at[:rows, :self.hidden_dim].set(h_static)

        # per-timestep Gaussian noise stream (host-generated; pipelined into the kernel per step)
        noise = jax.random.normal(k_noise, (self.n_timesteps, rows_pad, self.feat_pad), jnp.float32)

        # conditioning as mask/value so it is re-applied in-kernel after every step;
        # also pin padded rows and padded feature lanes to exactly 0.
        mask_np = np.zeros((rows_pad, self.feat_pad), np.float32)
        mask_np[:, self.transition_dim:] = 1.0
        mask_np[rows:, :] = 1.0
        vals = jnp.zeros((rows_pad, self.feat_pad), jnp.float32)
        for t_idx, val in cond.items():
            r_idx = np.arange(B) * H + t_idx
            mask_np[r_idx, :self.observation_dim] = 1.0
            vals = vals.at[jnp.asarray(r_idx), :self.observation_dim].set(val.astype(jnp.float32))
        mask = jnp.asarray(mask_np)

        out = _run_reverse_loop(
            self.coef_table, x0, hstat, self.h_temb_table,
            self.w1x_pad, self.w2_pad, self.b2_pad, noise, mask, vals,
            n_timesteps=self.n_timesteps, row_tile=row_tile,
            clip_denoised=self.clip_denoised, predict_epsilon=self.predict_epsilon)

        x_out = out[:rows, :Tdim].reshape(B, H, Tdim)
        # default_sample_fn path returns act unchanged.
        # TODO(synk): policy_guided_sample_fn / return_sequence chain / per-step metrics not implemented.
        return x_out, act, [], {}

    def conditional_sample(self, cond, act=None, horizon=None, key=None, **kwargs):
        batch_size = cond[0].shape[0]
        horizon = horizon or self.horizon
        shape = (batch_size, horizon, self.transition_dim)
        return self.p_sample_loop(shape, cond, act=act, key=key, **kwargs)

    def forward(self, cond, *args, **kwargs):
        return self.conditional_sample(cond, *args, **kwargs)


# ----------------------------------------------------------------------------
if __name__ == "__main__":
    B, horizon, obs_dim, action_dim = 2, 8, 6, 2
    n_timesteps = 8

    diffusion = GaussianDiffusionPallas(
        horizon=horizon, observation_dim=obs_dim, action_dim=action_dim,
        n_timesteps=n_timesteps, predict_epsilon=True, clip_denoised=False)

    key = jax.random.PRNGKey(0)
    k_cond, k_act, k_loop = jax.random.split(key, 3)
    cond = {0: jax.random.normal(k_cond, (B, obs_dim), jnp.float32)}      # condition at horizon step 0
    act = jax.random.normal(k_act, (B, horizon, action_dim), jnp.float32)

    x, act_out, seq, metrics = diffusion.forward(cond, act=act, key=k_loop)
    x = jax.block_until_ready(x)

    assert x.shape == (B, horizon, obs_dim + 2)
    assert bool(jnp.all(jnp.isfinite(x)))
    # conditioning must be exactly enforced on the final sample
    assert bool(jnp.allclose(x[:, 0, :obs_dim], cond[0], atol=1e-6))
    print("KERNEL_OK")
</pallas_src>

<mosaic_0001>
module attributes {stable_mosaic.version = 11 : i64} {
  func.func @reverse_diffusion_kernel(%arg0: i32, %arg1: i32, %arg2: memref<5x8xf32, #tpu.memory_space<smem>>, %arg3: memref<16x128xf32, #tpu.memory_space<vmem>>, %arg4: memref<16x128xf32, #tpu.memory_space<vmem>>, %arg5: memref<1x1x128xf32, #tpu.memory_space<vmem>>, %arg6: memref<128x128xbf16, #tpu.memory_space<vmem>>, %arg7: memref<128x128xbf16, #tpu.memory_space<vmem>>, %arg8: memref<1x128xf32, #tpu.memory_space<vmem>>, %arg9: memref<1x16x128xf32, #tpu.memory_space<vmem>>, %arg10: memref<16x128xf32, #tpu.memory_space<vmem>>, %arg11: memref<16x128xf32, #tpu.memory_space<vmem>>, %arg12: memref<16x128xf32, #tpu.memory_space<vmem>>) attributes {dimension_semantics = [#tpu.dimension_semantics<parallel>, #tpu.dimension_semantics<arbitrary>], iteration_bounds = array<i64: 1, 8>, scalar_prefetch = 0 : i64, scratch_operands = 0 : i64, tpu.core_type = #tpu.core_type<tc>, window_params = [{transform_indices = @transform_0, window_bounds = array<i64: 5, 8>}, {transform_indices = @transform_1, window_bounds = array<i64: 16, 128>}, {transform_indices = @transform_2, window_bounds = array<i64: 16, 128>}, {transform_indices = @transform_3, window_bounds = array<i64: 1, 1, 128>}, {pipeline_mode = #tpu.pipeline_mode<synchronous>, transform_indices = @transform_4, window_bounds = array<i64: 128, 128>}, {pipeline_mode = #tpu.pipeline_mode<synchronous>, transform_indices = @transform_5, window_bounds = array<i64: 128, 128>}, {pipeline_mode = #tpu.pipeline_mode<synchronous>, transform_indices = @transform_6, window_bounds = array<i64: 1, 128>}, {transform_indices = @transform_7, window_bounds = array<i64: 1, 16, 128>}, {transform_indices = @transform_8, window_bounds = array<i64: 16, 128>}, {transform_indices = @transform_9, window_bounds = array<i64: 16, 128>}, {transform_indices = @transform_10, window_bounds = array<i64: 16, 128>}]} {
    %c7_i32 = arith.constant 7 : i32
    %0 = arith.subi %c7_i32, %arg1 : i32
    %c0_i32 = arith.constant 0 : i32
    %1 = arith.cmpi eq, %arg1, %c0_i32 : i32
    %2 = arith.extui %1 : i1 to i32
    %c0_i32_0 = arith.constant 0 : i32
    %3 = arith.cmpi ne, %2, %c0_i32_0 : i32
    scf.if %3 {
      %c0_26 = arith.constant 0 : index
      %c0_27 = arith.constant 0 : index
      %57 = vector.load %arg3[%c0_26, %c0_27] : memref<16x128xf32, #tpu.memory_space<vmem>>, vector<16x128xf32>
      %c0_28 = arith.constant 0 : index
      %c0_29 = arith.constant 0 : index
      %58 = vector.load %arg12[%c0_28, %c0_29] : memref<16x128xf32, #tpu.memory_space<vmem>>, vector<16x128xf32>
      tpu.vector_store %arg12[%c0_28, %c0_29], %57 {strides = array<i32>} : memref<16x128xf32, #tpu.memory_space<vmem>>, vector<16x128xf32>,
    } else {
    }
    %c0 = arith.constant 0 : index
    %c0_1 = arith.constant 0 : index
    %4 = vector.load %arg12[%c0, %c0_1] : memref<16x128xf32, #tpu.memory_space<vmem>>, vector<16x128xf32>
    %5 = arith.truncf %4 : vector<16x128xf32> to vector<16x128xbf16>
    %c0_2 = arith.constant 0 : index
    %c0_3 = arith.constant 0 : index
    %6 = vector.load %arg6[%c0_2, %c0_3] : memref<128x128xbf16, #tpu.memory_space<vmem>>, vector<128x128xbf16>
    %cst = arith.constant dense<0.000000e+00> : vector<16x128xf32>
    %7 = tpu.matmul %5, %6, %cst {dimension_numbers = #tpu.dot_dimension_numbers<[1], [0], [0], [1], [0, 0, 1, 1], [], []>} : vector<16x128xbf16>, vector<128x128xbf16>, vector<16x128xf32> -> vector<16x128xf32>
    %c0_4 = arith.constant 0 : index
    %c0_5 = arith.constant 0 : index
    %8 = vector.load %arg4[%c0_4, %c0_5] : memref<16x128xf32, #tpu.memory_space<vmem>>, vector<16x128xf32>
    %9 = arith.addf %7, %8 : vector<16x128xf32>
    %c0_6 = arith.constant 0 : index
    %c0_7 = arith.constant 0 : index
    %c0_8 = arith.constant 0 : index
    %10 = vector.load %arg5[%c0_6, %c0_7, %c0_8] : memref<1x1x128xf32, #tpu.memory_space<vmem>>, vector<1x1x128xf32>
    %11 = vector.shape_cast %10 : vector<1x1x128xf32> to vector<1x128xf32>
    %12 = vector.broadcast %11 : vector<1x128xf32> to vector<16x128xf32>
    %13 = arith.addf %9, %12 : vector<16x128xf32>
    %14 = arith.negf %13 : vector<16x128xf32>
    %15 = math.exp %14 : vector<16x128xf32>
    %cst_9 = arith.constant 1.000000e+00 : f32
    %16 = vector.broadcast %cst_9 : f32 to vector<16x128xf32>
    %17 = arith.addf %16, %15 : vector<16x128xf32>
    %18 = arith.divf %16, %17 : vector<16x128xf32>
    %19 = arith.mulf %13, %18 : vector<16x128xf32>
    %20 = arith.truncf %19 : vector<16x128xf32> to vector<16x128xbf16>
    %c0_10 = arith.constant 0 : index
    %c0_11 = arith.constant 0 : index
    %21 = vector.load %arg7[%c0_10, %c0_11] : memref<128x128xbf16, #tpu.memory_space<vmem>>, vector<128x128xbf16>
    %cst_12 = arith.constant dense<0.000000e+00> : vector<16x128xf32>
    %22 = tpu.matmul %20, %21, %cst_12 {dimension_numbers = #tpu.dot_dimension_numbers<[1], [0], [0], [1], [0, 0, 1, 1], [], []>} : vector<16x128xbf16>, vector<128x128xbf16>, vector<16x128xf32> -> vector<16x128xf32>
    %c0_13 = arith.constant 0 : index
    %c0_14 = arith.constant 0 : index
    %23 = vector.load %arg8[%c0_13, %c0_14] : memref<1x128xf32, #tpu.memory_space<vmem>>, vector<1x128xf32>
    %24 = vector.broadcast %23 : vector<1x128xf32> to vector<16x128xf32>
    %25 = arith.addf %22, %24 : vector<16x128xf32>
    %c0_15 = arith.constant 0 : index
    %26 = arith.index_cast %0 : i32 to index
    %27 = memref.load %arg2[%c0_15, %26] : memref<5x8xf32, #tpu.memory_space<smem>>
    %c1 = arith.constant 1 : index
    %28 = arith.index_cast %0 : i32 to index
    %29 = memref.load %arg2[%c1, %28] : memref<5x8xf32, #tpu.memory_space<smem>>
    %c2 = arith.constant 2 : index
    %30 = arith.index_cast %0 : i32 to index
    %31 = memref.load %arg2[%c2, %30] : memref<5x8xf32, #tpu.memory_space<smem>>
    %c3 = arith.constant 3 : index
    %32 = arith.index_cast %0 : i32 to index
    %33 = memref.load %arg2[%c3, %32] : memref<5x8xf32, #tpu.memory_space<smem>>
    %c4 = arith.constant 4 : index
    %34 = arith.index_cast %0 : i32 to index
    %35 = memref.load %arg2[%c4, %34] : memref<5x8xf32, #tpu.memory_space<smem>>
    %36 = vector.broadcast %27 : f32 to vector<16x128xf32>
    %37 = arith.mulf %36, %4 : vector<16x128xf32>
    %38 = vector.broadcast %29 : f32 to vector<16x128xf32>
    %39 = arith.mulf %38, %25 : vector<16x128xf32>
    %40 = arith.subf %37, %39 : vector<16x128xf32>
    %41 = vector.broadcast %31 : f32 to vector<16x128xf32>
    %42 = arith.mulf %41, %40 : vector<16x128xf32>
    %43 = vector.broadcast %33 : f32 to vector<16x128xf32>
    %44 = arith.mulf %43, %4 : vector<16x128xf32>
    %45 = arith.addf %42, %44 : vector<16x128xf32>
    %c0_16 = arith.constant 0 : index
    %c0_17 = arith.constant 0 : index
    %c0_18 = arith.constant 0 : index
    %46 = vector.load %arg9[%c0_16, %c0_17, %c0_18] : memref<1x16x128xf32, #tpu.memory_space<vmem>>, vector<1x16x128xf32>
    %47 = vector.shape_cast %46 : vector<1x16x128xf32> to vector<16x128xf32>
    %48 = vector.broadcast %35 : f32 to vector<16x128xf32>
    %49 = arith.mulf %48, %47 : vector<16x128xf32>
    %50 = arith.addf %45, %49 : vector<16x128xf32>
    %c0_19 = arith.constant 0 : index
    %c0_20 = arith.constant 0 : index
    %51 = vector.load %arg10[%c0_19, %c0_20] : memref<16x128xf32, #tpu.memory_space<vmem>>, vector<16x128xf32>
    %cst_21 = arith.constant 5.000000e-01 : f32
    %52 = vector.broadcast %cst_21 : f32 to vector<16x128xf32>
    %53 = arith.cmpf ogt, %51, %52 : vector<16x128xf32>
    %c0_22 = arith.constant 0 : index
    %c0_23 = arith.constant 0 : index
    %54 = vector.load %arg11[%c0_22, %c0_23] : memref<16x128xf32, #tpu.memory_space<vmem>>, vector<16x128xf32>
    %55 = arith.select %53, %54, %50 : vector<16x128xi1>, vector<16x128xf32>
    %c0_24 = arith.constant 0 : index
    %c0_25 = arith.constant 0 : index
    %56 = vector.load %arg12[%c0_24, %c0_25] : memref<16x128xf32, #tpu.memory_space<vmem>>, vector<16x128xf32>
    tpu.vector_store %arg12[%c0_24, %c0_25], %55 {strides = array<i32>} : memref<16x128xf32, #tpu.memory_space<vmem>>, vector<16x128xf32>,
    return
  }
  func.func @transform_0(%arg0: i32, %arg1: i32) -> (i32, i32) {
    %c0_i32 = arith.constant 0 : i32
    %c0_i32_0 = arith.constant 0 : i32
    %c0_i32_1 = arith.constant 0 : i32
    return %c0_i32, %c0_i32_0 : i32, i32
  }
  func.func @transform_1(%arg0: i32, %arg1: i32) -> (i32, i32) {
    %c0_i32 = arith.constant 0 : i32
    %c0_i32_0 = arith.constant 0 : i32
    return %arg0, %c0_i32 : i32, i32
  }
  func.func @transform_2(%arg0: i32, %arg1: i32) -> (i32, i32) {
    %c0_i32 = arith.constant 0 : i32
    %c0_i32_0 = arith.constant 0 : i32
    return %arg0, %c0_i32 : i32, i32
  }
  func.func @transform_3(%arg0: i32, %arg1: i32) -> (i32, i32, i32) {
    %c7_i32 = arith.constant 7 : i32
    %0 = arith.subi %c7_i32, %arg1 : i32
    %c0_i32 = arith.constant 0 : i32
    %c0_i32_0 = arith.constant 0 : i32
    %c0_i32_1 = arith.constant 0 : i32
    return %0, %c0_i32, %c0_i32_0 : i32, i32, i32
  }
  func.func @transform_4(%arg0: i32, %arg1: i32) -> (i32, i32) {
    %c0_i32 = arith.constant 0 : i32
    %c0_i32_0 = arith.constant 0 : i32
    %c0_i32_1 = arith.constant 0 : i32
    return %c0_i32, %c0_i32_0 : i32, i32
  }
  func.func @transform_5(%arg0: i32, %arg1: i32) -> (i32, i32) {
    %c0_i32 = arith.constant 0 : i32
    %c0_i32_0 = arith.constant 0 : i32
    %c0_i32_1 = arith.constant 0 : i32
    return %c0_i32, %c0_i32_0 : i32, i32
  }
  func.func @transform_6(%arg0: i32, %arg1: i32) -> (i32, i32) {
    %c0_i32 = arith.constant 0 : i32
    %c0_i32_0 = arith.constant 0 : i32
    %c0_i32_1 = arith.constant 0 : i32
    return %c0_i32, %c0_i32_0 : i32, i32
  }
  func.func @transform_7(%arg0: i32, %arg1: i32) -> (i32, i32, i32) {
    %c7_i32 = arith.constant 7 : i32
    %0 = arith.subi %c7_i32, %arg1 : i32
    %c0_i32 = arith.constant 0 : i32
    %c0_i32_0 = arith.constant 0 : i32
    return %0, %arg0, %c0_i32 : i32, i32, i32
  }
  func.func @transform_8(%arg0: i32, %arg1: i32) -> (i32, i32) {
    %c0_i32 = arith.constant 0 : i32
    %c0_i32_0 = arith.constant 0 : i32
    return %arg0, %c0_i32 : i32, i32
  }
  func.func @transform_9(%arg0: i32, %arg1: i32) -> (i32, i32) {
    %c0_i32 = arith.constant 0 : i32
    %c0_i32_0 = arith.constant 0 : i32
    return %arg0, %c0_i32 : i32, i32
  }
  func.func @transform_10(%arg0: i32, %arg1: i32) -> (i32, i32) {
    %c0_i32 = arith.constant 0 : i32
    %c0_i32_0 = arith.constant 0 : i32
    return %arg0, %c0_i32 : i32, i32
  }
}

</mosaic_0001>

<bundles_post_ra>
// kernel: tpu_custom_call.1
= control target key start
LH: loop header
LB: loop body
LE: loop exit
PB: predicated region body
PF: predicated region fallthrough
CT: control target
= control target key end

     0   :  { %s2066_s0 = inlined_call_operand.hbm [shape: f32[5,8], index: 0, kind: input, shape index: {}]   ;;  %s2067_s1 = inlined_call_operand.hbm [shape: f32[16,128], index: 1, kind: input, shape index: {}]   ;;  %s2068_s2 = inlined_call_operand.hbm [shape: f32[16,128], index: 2, kind: input, shape index: {}]   ;;  %s2069_s3 = inlined_call_operand.hbm [shape: f32[8,1,128], index: 3, kind: input, shape index: {}]   ;;  %s2070_s4 = inlined_call_operand.hbm [shape: bf16[128,128], index: 4, kind: input, shape index: {}]   ;;  %s2071_s5 = inlined_call_operand.hbm [shape: bf16[128,128], index: 5, kind: input, shape index: {}]   ;;  %s2072_s6 = inlined_call_operand.vmem [shape: f32[1,128], index: 6, kind: input, shape index: {}]   ;;  %s2073_s7 = inlined_call_operand.hbm [shape: f32[8,16,128], index: 7, kind: input, shape index: {}]   ;;  %s2074_s8 = inlined_call_operand.vmem [shape: f32[16,128], index: 8, kind: input, shape index: {}]   ;;  %s2075_s9 = inlined_call_operand.vmem [shape: f32[16,128], index: 9, kind: input, shape index: {}]   ;;  %s2076_s10 = inlined_call_operand.hbm [shape: f32[16,128], index: 10, kind: output, shape index: {}]  }
   0x1   :  { %2092 = sst [smem:[#allocation26_spill]] %s2066_s0 }
   0x2   :  { %2093 = sst [smem:[#allocation27_spill]] %s2067_s1 }
   0x3   :  { %2094 = sst [smem:[#allocation28_spill]] %s2068_s2 }
   0x4   :  { %2095 = sst [smem:[#allocation29_spill]] %s2069_s3 }
   0x5   :  { %2096 = sst [smem:[#allocation30_spill]] %s2074_s8 }
   0x6   :  { %2097 = sst [smem:[#allocation31_spill]] %s2075_s9 }
   0x7   :  { %2098 = sst [smem:[#allocation32_spill]] %s2076_s10 }
   0x8   :  { %15 = vsyncpa [#allocation5], 0 }
   0x9   :  { %16 = vsyncpa [#allocation3], 0 }
   0xa   :  { %17 = vsyncpa [#allocation8], 0 }
   0xb   :  { %18 = vsyncpa [#allocation12], 0 }
   0xc   :  { %19 = vsyncpa [#allocation4], 0  ;;  %s1674_s13 = smov 0   ;;  %s1676_s14 = smov 0  }
   0xd   :  { %s1678_s15 = smov 0   ;;  %s1680_s16 = smov 0  }
   0xe   :  { %s1682_s17 = smov 0   ;;  %s1684_s18 = smov 0  }
   0xf LB: > { %2099 = sst [smem:[#allocation23_spill]] %s1597_s17  ;;  %s1603_s19 = smov [#allocation6]   ;;  %s1601_s18 = sphi %s1684_s18, %s25_s18   ;;  %s1597_s17 = sphi %s1682_s17, %s2135_s17   ;;  %s1593_s16 = sphi %s1680_s16, %s2139_s16   ;;  %s1589_s15 = sphi %s1678_s15, %s2138_s15   ;;  %s1585_s14 = sphi %s1676_s14, %s2137_s14   ;;  %s1581_s13 = sphi %s1674_s13, %s2136_s13  }
  0x10   : > { %s338_s20 = sshll.u32 %s1603_s19, 4  ;;  %s1705_s21 = sadd.s32 4294967295, %s1601_s18   ;;  %s1710_s20 = int_to_ptr.vmem [resolvable:$true] %s338_s20 }
  0x11   : > { %p1046_p0 = scmp.ge.s32.totalorder %s1601_s18, 1  ;;  %p2084_p1 = scmp.eq.s32.totalorder %s1705_s21, 0 }
  0x12   : > { %p314_p2 = scmp.lt.s32.totalorder %s1601_s18, 9  ;;  %s1604_s23 = smov [#allocation7]  }
  0x13   : > { %s354_s24 = sshll.u32 %s1604_s23, 4  ;;  %s2102_s1 = sld [smem:[#allocation27_spill]]  ;;  %s1724_s24 = int_to_ptr.vmem [resolvable:$true] %s354_s24 }
  0x14   : > { %p1712_p3 = pnand %p1046_p0, %p314_p2 }
  0x16   : > { %s2100_s22 = scalar_select %p1712_p3, 1, 0 }
  0x17   : > { %p1190_p4 = pneg %p1712_p3 }
  0x19   : > { %p1720_p5 = pnand %p1190_p4, %p2084_p1  ;;  %s1312_s28 = scalar_lea.hbm %s2102_s1, 256 }
  0x1a   : > { %p1313_p6 = scmp.ne.s32.totalorder %s2102_s1, %s1312_s28  ;;  %p1319_p10 = scmp.lt.u32.totalorder %s1312_s28, %s2102_s1 }
  0x1b   : > { %s2101_s25 = scalar_select %p1720_p5, 1, 0 }
  0x1c   : > { %p1734_p7 = pneg %p1720_p5 }
  0x1e   : > { %p1315_p8 = pnand %p1734_p7, %p1313_p6 }
  0x20   : > { %p1316_p9 = pneg %p1315_p8 }
  0x22   : > { %p1321_p11 = pnand %p1319_p10, %p1316_p9 }
  0x24   : > { %1324 = shalt.err (!%p1321_p11)
}
  0x25   : > { %s1325_s23 = scalar_lea.vmem %s1710_s20, 256  ;;  %p1333_p2 = scmp.lt.s32.totalorder %s1710_s20, %s1710_s20 }
  0x26   : > { %p1326_p12 = scmp.ne.s32.totalorder %s1710_s20, %s1325_s23  ;;  %p1334_p4 = scmp.lt.s32.totalorder %s1325_s23, %s1325_s23 }
  0x28   : > { %p1328_p13 = pnand %p1326_p12, %p1734_p7  ;;  %p1335_p6 = por %p1334_p4, %p1333_p2 }
  0x2a   : > { %p1329_p0 = pneg %p1328_p13 }
  0x2c   : > { %p1336_p8 = pnand %p1335_p6, %p1329_p0 }
  0x2e   : > { %1339 = shalt.err (!%p1336_p8)
}
  0x2f   : > { %s2080_s26 = smov 128   ;;  %s2081_s27 = smov 8  }
  0x30   : > { %1196 = dma.hbm_to_vmem [thread:$0]  (!%p1720_p5), %s2102_s1, 256, %s1710_s20, [#allocation3], %s2080_s26, %s2080_s26, %s2081_s27  }
  0x31   : > { %s2104_s2 = sld [smem:[#allocation28_spill]] }
  0x37   : > { %s1340_s19 = scalar_lea.hbm %s2104_s2, 256 }
  0x38   : > { %p1341_p9 = scmp.ne.s32.totalorder %s2104_s2, %s1340_s19  ;;  %p1347_p12 = scmp.lt.u32.totalorder %s1340_s19, %s2104_s2 }
  0x3a   : > { %p1343_p10 = pnand %p1341_p9, %p1734_p7 }
  0x3c   : > { %p1344_p11 = pneg %p1343_p10 }
  0x3e   : > { %p1349_p13 = pnand %p1347_p12, %p1344_p11 }
  0x40   : > { %1352 = shalt.err (!%p1349_p13)
}
  0x41   : > { %s1353_s20 = scalar_lea.vmem %s1724_s24, 256  ;;  %p1361_p6 = scmp.lt.s32.totalorder %s1724_s24, %s1724_s24 }
  0x42   : > { %p1354_p0 = scmp.ne.s32.totalorder %s1724_s24, %s1353_s20  ;;  %p1362_p8 = scmp.lt.s32.totalorder %s1353_s20, %s1353_s20 }
  0x44   : > { %p1356_p2 = pnand %p1354_p0, %p1734_p7  ;;  %p1363_p9 = por %p1362_p8, %p1361_p6 }
  0x46   : > { %p1357_p4 = pneg %p1356_p2 }
  0x48   : > { %p1364_p10 = pnand %p1363_p9, %p1357_p4 }
  0x4a   : > { %1367 = shalt.err (!%p1364_p10)
}
  0x4b   : > { %1199 = dma.hbm_to_vmem [thread:$0]  (!%p1720_p5), %s2104_s2, 256, %s1724_s24, [#allocation8], %s2080_s26, %s2080_s26, %s2081_s27  }
  0x4c   : > { %s34_s10 = sadd.s32 1, %s1597_s17  ;;  %s1786_s28 = ssub.s32 7, %s1597_s17 }
  0x4d   : > { %p35_p11 = scmp.ge.s32.totalorder %s34_s10, 8  ;;  %s119_s29 = sadd.s32 1, %s1589_s15 }
  0x4e   : > { %p126_p12 = scmp.ne.s32.totalorder %s1589_s15, %s1585_s14  ;;  %p127_p13 = scmp.eq.s32.totalorder %s1601_s18, 0 }
  0x4f   : > { %s2141_s10 = smov (%p35_p11, %s34_s10), 0  ;;  %p132_p2 = scmp.ne.s32.totalorder %s1585_s14, %s1581_s13 }
  0x50   : > { %2105 = sst [smem:[#allocation24_spill]] %s2141_s10  ;;  %p1794_p0 = por %p127_p13, %p126_p12 }
  0x51   : > { %s115_s24 = ssub.s32 7, %s2141_s10  ;;  %p1218_p4 = scmp.lt.s32.totalorder %s1601_s18, 8 }
  0x52   : > { %s116_s12 = ssub.s32 %s1786_s28, %s115_s24  ;;  %p1805_p6 = por %p2084_p1, %p132_p2 }
  0x53   : > { %p117_p8 = scmp.eq.s32.totalorder %s116_s12, 0  ;;  %s415_s23 = sand.u32 1, %s1601_s18  }
  0x54   : > { %s2107_s19 = scalar_select %p1805_p6, 1, 0 }
  0x55   : > { %s417_s20 = sand.u32 1, %s1589_s15   ;;  %s1055_s9 = sshll.u32 %s1786_s28, 4 }
  0x56   : > { %s1812_s8 = scalar_select %p117_p8, %s1589_s15, %s119_s29  }
  0x57   : > { %s2109_s3 = sld [smem:[#allocation29_spill]]  ;;  %s418_s13 = scalar_lea.vmem [#allocation9], %s417_s20 }
  0x58   : > { %2108 = sst [smem:[#allocation25_spill]] %s1812_s8  ;;  %s426_s24 = sshll.u32 %s418_s13, 4  ;;  %s1820_s24 = int_to_ptr.vmem [resolvable:$true] %s426_s24 }
  0x59   : > { %p1824_p9 = pnand %p1218_p4, %p1794_p0  ;;  %s1828_s29 = sshll.u32 %s417_s20, 4 }
  0x5a   : > { %s1095_s26 = sshll.u32 %s1786_s28, 8  ;;  %s1831_s27 = scalar_lea.sflag [#allocation3], %s415_s23 }
  0x5b   : > { %s2110_s12 = scalar_select %p1824_p9, 1, 0 }
  0x5c   : > { %p2089_p11 = pneg %p1824_p9 }
  0x5d   : > { %s1818_s1 = scalar_lea.hbm %s2109_s3, %s1055_s9  ;;  %s1373_s2 = scalar_lea.hbm %s2109_s3, 128 }
  0x5e   : > { %s1368_s9 = scalar_lea.hbm %s1818_s1, 16  ;;  %p1374_p0 = scmp.lt.u32.totalorder %s1818_s1, %s2109_s3 }
  0x5f   : > { %p1369_p10 = scmp.ne.s32.totalorder %s1818_s1, %s1368_s9  ;;  %p1375_p2 = scmp.lt.u32.totalorder %s1373_s2, %s1368_s9 }
  0x60   : > { %p1377_p8 = scmp.lt.u32.totalorder %s1368_s9, %s1818_s1 }
  0x61   : > { %p1371_p12 = pnand %p2089_p11, %p1369_p10  ;;  %p1376_p4 = por %p1375_p2, %p1374_p0 }
  0x63   : > { %p1372_p13 = pneg %p1371_p12  ;;  %p1378_p1 = por %p1377_p8, %p1376_p4 }
  0x65   : > { %p1379_p6 = pnand %p1378_p1, %p1372_p13 }
  0x67   : > { %1382 = shalt.err (!%p1379_p6)
}
  0x68   : > { %s1383_s23 = scalar_lea.vmem %s1820_s24, 16  ;;  %s1607_s20 = smov [#allocation9]  }
  0x69   : > { %p1384_p10 = scmp.ne.s32.totalorder %s1820_s24, %s1383_s23  ;;  %s1388_s30 = sshll.u32 %s1607_s20, 4  ;;  %s1389_s30 = int_to_ptr.vmem [resolvable:$false] %s1388_s30 }
  0x6a   : > { %s1390_s17 = scalar_lea.vmem %s1389_s30, 32  ;;  %p1391_p5 = scmp.lt.s32.totalorder %s1820_s24, %s1389_s30 }
  0x6b   : > { %p1386_p12 = pnand %p1384_p10, %p2089_p11  ;;  %p1392_p0 = scmp.lt.s32.totalorder %s1390_s17, %s1383_s23 }
  0x6d   : > { %p1387_p3 = pneg %p1386_p12  ;;  %p1393_p2 = por %p1392_p0, %p1391_p5 }
  0x6f   : > { %p1394_p4 = pnand %p1393_p2, %p1387_p3 }
  0x71   : > { %1397 = shalt.err (!%p1394_p4)
}
  0x72   : > { %1209 = dma.hbm_to_vmem [thread:$0]  (!%p1824_p9), %s1818_s1, 16, %s1820_s24, %s1831_s27  }
  0x73   : > { %s1864_s9 = scalar_lea.hbm %s2073_s7, %s1095_s26  ;;  %s437_s13 = scalar_lea.vmem [#allocation13], %s1828_s29 }
  0x74   : > { %s1867_s23 = sshll.u32 %s437_s13, 4  ;;  %s2111_s0 = sld [smem:[#allocation26_spill]]  ;;  %s1904_s23 = int_to_ptr.vmem [resolvable:$true] %s1867_s23 }
  0x7a   : > { %s1398_s17 = scalar_lea.hbm %s2111_s0, 128 }
  0x7b   : > { %p1399_p1 = scmp.ne.s32.totalorder %s2111_s0, %s1398_s17  ;;  %p1405_p6 = scmp.lt.u32.totalorder %s1398_s17, %s2111_s0 }
  0x7d   : > { %p1401_p3 = pnand %p1399_p1, %p1734_p7 }
  0x7f   : > { %p1402_p5 = pneg %p1401_p3 }
  0x81   : > { %p1407_p13 = pnand %p1405_p6, %p1402_p5 }
  0x83   : > { %1410 = shalt.err (!%p1407_p13)
}
  0x84   : > { %s1608_s24 = smov [#allocation2]   ;;  %p2112_p8 = scmp.ne.s32.totalorder %s2101_s25, 0 }
  0x85   : > { %s1609_s2 = smov [#allocation10]   ;;  %s1411_s13 = scalar_lea.hbm %s2070_s4, 1024 }
  0x86   : > { %1193 = dma.hbm_to_smem (!%p2112_p8), %s2111_s0, 128, %s1608_s24, [#allocation5]  }
  0x87   : > { %s367_s3 = sshll.u32 %s1609_s2, 4  ;;  %p1412_p10 = scmp.ne.s32.totalorder %s2070_s4, %s1411_s13  ;;  %s368_s3 = int_to_ptr.vmem [resolvable:$true] %s367_s3 }
  0x88   : > { %p1418_p2 = scmp.lt.u32.totalorder %s1411_s13, %s2070_s4 }
  0x89   : > { %p1414_p12 = pnand %p1412_p10, %p1734_p7 }
  0x8b   : > { %p1415_p0 = pneg %p1414_p12 }
  0x8d   : > { %p1420_p4 = pnand %p1418_p2, %p1415_p0 }
  0x8f   : > { %1423 = shalt.err (!%p1420_p4)
}
  0x90   : > { %s1424_s28 = scalar_lea.vmem %s368_s3, 1024  ;;  %p1432_p6 = scmp.lt.s32.totalorder %s368_s3, %s368_s3 }
  0x91   : > { %p1425_p1 = scmp.ne.s32.totalorder %s368_s3, %s1424_s28  ;;  %p1433_p13 = scmp.lt.s32.totalorder %s1424_s28, %s1424_s28 }
  0x93   : > { %p1427_p3 = pnand %p1425_p1, %p1734_p7  ;;  %p1434_p11 = por %p1433_p13, %p1432_p6 }
  0x95   : > { %p1428_p5 = pneg %p1427_p3 }
  0x97   : > { %p1435_p9 = pnand %p1434_p11, %p1428_p5 }
  0x99   : > { %1438 = shalt.err (!%p1435_p9)
}
  0x9a   : > { %s1610_s24 = smov 64   ;;  %s1611_s29 = smov 4  }
  0x9b   : > { %1202 = dma.hbm_to_vmem [thread:$0]  (!%p2112_p8), %s2070_s4, 1024, %s368_s3, [#allocation8], %s1610_s24, %s1610_s24, %s1611_s29  }
  0x9c   : > { %s1612_s8 = smov [#allocation11]   ;;  %s1439_s30 = scalar_lea.hbm %s2071_s5, 1024 }
  0x9d   : > { %s380_s10 = sshll.u32 %s1612_s8, 4  ;;  %p1440_p9 = scmp.ne.s32.totalorder %s2071_s5, %s1439_s30  ;;  %s381_s10 = int_to_ptr.vmem [resolvable:$true] %s380_s10 }
  0x9e   : > { %p1446_p12 = scmp.lt.u32.totalorder %s1439_s30, %s2071_s5 }
  0x9f   : > { %p1442_p11 = pnand %p1440_p9, %p1734_p7 }
  0xa1   : > { %p1443_p10 = pneg %p1442_p11 }
  0xa3   : > { %p1448_p0 = pnand %p1446_p12, %p1443_p10 }
  0xa5   : > { %1451 = shalt.err (!%p1448_p0)
}
  0xa6   : > { %s1452_s3 = scalar_lea.vmem %s381_s10, 1024  ;;  %p1460_p3 = scmp.lt.s32.totalorder %s381_s10, %s381_s10 }
  0xa7   : > { %p1453_p2 = scmp.ne.s32.totalorder %s381_s10, %s1452_s3  ;;  %p1461_p5 = scmp.lt.s32.totalorder %s1452_s3, %s1452_s3 }
  0xa9   : > { %p1455_p4 = pnand %p1453_p2, %p1734_p7  ;;  %p1462_p6 = por %p1461_p5, %p1460_p3 }
  0xab   : > { %p1456_p1 = pneg %p1455_p4 }
  0xad   : > { %p1463_p13 = pnand %p1462_p6, %p1456_p1 }
  0xaf   : > { %1466 = shalt.err (!%p1463_p13)
}
  0xb0   : > { %1205 = dma.hbm_to_vmem [thread:$0]  (!%p2112_p8), %s2071_s5, 1024, %s381_s10, [#allocation12], %s1610_s24, %s1610_s24, %s1611_s29  }
  0xb1   : > { %s1467_s0 = scalar_lea.hbm %s1864_s9, 256  ;;  %p2113_p7 = scmp.ne.s32.totalorder %s2110_s12, 0 }
  0xb2   : > { %p1468_p9 = scmp.ne.s32.totalorder %s1864_s9, %s1467_s0  ;;  %s1472_s13 = scalar_lea.hbm %s2073_s7, 2048 }
  0xb3   : > { %p2114_p11 = pneg %p2113_p7  ;;  %p1473_p0 = scmp.lt.u32.totalorder %s1864_s9, %s2073_s7 }
  0xb4   : > { %p1474_p2 = scmp.lt.u32.totalorder %s1472_s13, %s1467_s0  ;;  %p1476_p1 = scmp.lt.u32.totalorder %s1467_s0, %s1864_s9 }
  0xb5   : > { %p1470_p10 = pnand %p1468_p9, %p2114_p11 }
  0xb6   : > { %p1475_p4 = por %p1474_p2, %p1473_p0 }
  0xb7   : > { %p1471_p12 = pneg %p1470_p10 }
  0xb8   : > { %p1477_p3 = por %p1476_p1, %p1475_p4 }
  0xba   : > { %p1478_p5 = pnand %p1477_p3, %p1471_p12 }
  0xbc   : > { %1481 = shalt.err (!%p1478_p5)
}
  0xbd   : > { %s1482_s24 = scalar_lea.vmem %s1904_s23, 256  ;;  %p2115_p6 = pmov %p2114_p11 }
  0xbe   : > { %p1483_p8 = scmp.ne.s32.totalorder %s1904_s23, %s1482_s24  ;;  %s1613_s29 = smov [#allocation13]  }
  0xbf   : > { %s1487_s10 = sshll.u32 %s1613_s29, 4  ;;  %s1488_s10 = int_to_ptr.vmem [resolvable:$false] %s1487_s10 }
  0xc0   : > { %p1485_p13 = pnand %p1483_p8, %p2115_p6  ;;  %s1489_s30 = scalar_lea.vmem %s1488_s10, 512 }
  0xc1   : > { %p1490_p11 = scmp.lt.s32.totalorder %s1904_s23, %s1488_s10  ;;  %p1491_p10 = scmp.lt.s32.totalorder %s1489_s30, %s1482_s24 }
  0xc2   : > { %p1486_p9 = pneg %p1485_p13 }
  0xc3   : > { %p1492_p0 = por %p1491_p10, %p1490_p11 }
  0xc5   : > { %p1493_p2 = pnand %p1492_p0, %p1486_p9 }
  0xc7   : > { %1496 = shalt.err (!%p1493_p2)
}
  0xc8   : > { %s2116_s17 = smov 8   ;;  %s2117_s1 = smov 128  }
  0xc9   : > { %1212 = dma.hbm_to_vmem [thread:$0]  (!%p2113_p7), %s1864_s9, 256, %s1904_s23, %s1831_s27, %s2117_s1, %s2117_s1, %s2116_s17  }
  0xca   : > { %p2118_p12 = scmp.ne.s32.totalorder %s2100_s22, 0 }
  0xcb   : > { %p2119_p4 = scmp.eq.s32.totalorder (!%p2118_p12), %s1705_s21, 0 }
  0xcc   : > { %459 = sbr.rel (%p2118_p12) target bundleno = 774 (0x306), region = 60 }
  0xd3   : > { %1548 = dma.done.wait (%p2119_p4), [#allocation5], 128   ;;  %p2120_p1 = pmov %p2119_p4 }
  0xd5   : > { %1550 = vsyncadd (%p2120_p1), [#allocation5], 4294967168  ;;  %p2121_p3 = pmov %p2120_p1 }
  0xd6   : > { %p2122_p5 = pmov %p2120_p1 }
  0xd7   : > { %1552 = dma.done.wait (%p2121_p3), [#allocation3], 256  }
  0xd8   : > { %1554 = vsyncadd (%p2122_p5), [#allocation3], 4294967040  ;;  %p2123_p8 = pmov %p2120_p1 }
  0xd9   : > { %p2124_p7 = pmov %p2120_p1 }
  0xda   : > { %1556 = dma.done.wait (%p2123_p8), [#allocation8], 256  }
  0xdb   : > { %1558 = vsyncadd (%p2124_p7), [#allocation8], 4294967040  ;;  %s473_s22 = sand.u32 1, %s1705_s21   ;;  %s475_s12 = sand.u32 1, %s1585_s14  }
  0xdc   : > { %s474_s27 = scalar_lea.sflag [#allocation3], %s473_s22  ;;  %s1967_s9 = scalar_lea.vmem [#allocation9], %s475_s12 }
  0xdd   : > { %p2125_p6 = scmp.ne.s32.totalorder %s2107_s19, 0 }
  0xdf   : > { %1560 = dma.done.wait (%p2125_p6), %s474_s27, 16  }
  0xe0   : > { %1562 = vsyncadd (%p2125_p6), %s474_s27, 4294967280  ;;  %p2126_p13 = pmov %p2120_p1 }
  0xe1   : > { %p2127_p9 = pmov %p2120_p1 }
  0xe2   : > { %1564 = dma.done.wait (%p2126_p13), [#allocation8], 1024  }
  0xe3   : > { %1566 = vsyncadd (%p2127_p9), [#allocation8], 4294966272  ;;  %p2128_p11 = pmov %p2120_p1 }
  0xe4   : > { %p2129_p10 = pmov %p2120_p1 }
  0xe5   : > { %1568 = dma.done.wait (%p2128_p11), [#allocation12], 1024  }
  0xe6   : > { %1570 = vsyncadd (%p2129_p10), [#allocation12], 4294966272  ;;  %s1981_s23 = sshll.u32 %s475_s12, 4 }
  0xe7   : > { %s493_s28 = scalar_lea.vmem [#allocation13], %s1981_s23 }
  0xe8   : > { %1572 = dma.done.wait (%p2125_p6), %s474_s27, 256  }
  0xe9   : > { %1574 = vsyncadd (%p2125_p6), %s474_s27, 4294967040 }
  0xea   : > { %498 = sfence }
  0xeb   : > { %s1989_s3 = ssub.s32 7, %s1593_s16  ;;  %p1066_p0 = scmp.ne.s32.totalorder %s1593_s16, 0 }
  0xec   : > { %v564_v0 = vld [vmem:[#allocation6] sm:$0xff] (!%p1066_p0)  ;;  %v565_v1 = vld [vmem:[#allocation6 + $0x8] sm:$0xff] (!%p1066_p0) }
  0xed   : > { %563 = sbr.rel (%p1066_p0) target bundleno = 244 (0xf4), region = 92  ;;  %566 = vst [vmem:[#allocation14] sm:$0xff] (!%p1066_p0), %v564_v0  ;;  %567 = vst [vmem:[#allocation14 + $0x8] sm:$0xff] (!%p1066_p0), %v565_v1 }
  0xf4 PF: > { %v1288_v2 = vld [vmem:[#allocation10] sm:$0xff]   ;;  %v1614_v3 = vmov 0.0   ;;  %v1289_v4 = vld [vmem:[#allocation10 + $0x8] sm:$0xff]   ;;  %vm1615_vm0 = vmmov 0   ;;  %v1290_v5 = vld [vmem:[#allocation10 + $0x10] sm:$0xff]   ;;  %s815_s16 = sshra.s32 %s1989_s3, 7 }
  0xf5   : > { %1122 = vmatprep.subr.bf16.mxu0 %v1614_v3  ;;  %1142 = vmatprep.subr.bf16.mxu1 %v1614_v3  ;;  %v1291_v6 = vld [vmem:[#allocation10 + $0x18] sm:$0xff]   ;;  %v1292_v7 = vld [vmem:[#allocation10 + $0x20] sm:$0xff]   ;;  %v1293_v8 = vld [vmem:[#allocation10 + $0x28] sm:$0xff]   ;;  %s1096_s19 = sshll.u32 %s815_s16, 7  ;;  %s820_s2 = sand.u32 127, %s1989_s3 }
  0xf6   : > { %1123 = vmatpush3.bf16.msra.mxu0 %v1288_v2  ;;  %1138 = vmatprep.mubr.msk.bf16.mxu0 %vm1615_vm0, %v1614_v3  ;;  %v1294_v9 = vld [vmem:[#allocation10 + $0x30] sm:$0xff]   ;;  %v1295_v10 = vld [vmem:[#allocation10 + $0x38] sm:$0xff]   ;;  %v1992_v11 = vld [vmem:[#allocation14] sm:$0xff]  ;;  %s1097_s26 = sadd.s32 128, %s1096_s19  ;;  %s1101_s0 = sadd.s32 384, %s1096_s19 }
  0xf7   : > { %1124 = vmatprep.subr.bf16.mxu0 %v1614_v3  ;;  %1158 = vmatprep.mubr.msk.bf16.mxu1 %vm1615_vm0, %v1614_v3  ;;  %v1994_v12 = vld [vmem:[#allocation14 + $0x8] sm:$0xff]  ;;  %v1296_v14 = vld [vmem:[#allocation11] sm:$0xff]   ;;  %v1298_v16 = vld [vmem:[#allocation11 + $0x10] sm:$0xff]   ;;  %s814_s11 = sld [smem:[#allocation2 + %s1989_s3]]  ;;  %s821_s8 = sadd.s32 %s1097_s26, %s820_s2 }
  0xf8   : > { %v570_v13 = vpack.c.bf16 %v1994_v12, %v1992_v11  ;;  %1143 = vmatpush3.bf16.msra.mxu1 %v1296_v14  ;;  %v1297_v15 = vld [vmem:[#allocation11 + $0x8] sm:$0xff]   ;;  %v1299_v17 = vld [vmem:[#allocation11 + $0x18] sm:$0xff]   ;;  %v1300_v18 = vld [vmem:[#allocation11 + $0x20] sm:$0xff]   ;;  %s1099_s13 = sadd.s32 256, %s1096_s19  ;;  %s1103_s25 = sadd.s32 512, %s1096_s19 }
  0xf9   : > { %1144 = vmatprep.subr.bf16.mxu1 %v1614_v3  ;;  %v1301_v19 = vld [vmem:[#allocation11 + $0x28] sm:$0xff]   ;;  %v1302_v20 = vld [vmem:[#allocation11 + $0x30] sm:$0xff]   ;;  %v1303_v21 = vld [vmem:[#allocation11 + $0x38] sm:$0xff]   ;;  %s829_s20 = sadd.s32 %s1101_s0, %s820_s2  ;;  %s822_s24 = sld [smem:[#allocation2 + %s821_s8]] }
  0xfa   : > { %1125 = vmatpush3.bf16.msra.mxu0 %v1289_v4  ;;  %v587_v22 = vld [vmem:[#allocation7] sm:$0xff]  ;;  %v1075_v24 = vld [vmem:[%s1967_s9] ss:$0 sm:$0xff]  ;;  %v588_v25 = vld [vmem:[#allocation7 + $0x8] sm:$0xff]  ;;  %s825_s29 = sadd.s32 %s1099_s13, %s820_s2  ;;  %s833_s10 = sadd.s32 %s1103_s25, %s820_s2 }
  0xfb   : > { %1126 = vmatprep.subr.bf16.mxu0 %v1614_v3  ;;  %s830_s30 = sld [smem:[#allocation2 + %s829_s20]]  ;;  %v1078_v44 = vld [vmem:[%s2072_s6] ss:$0 sm:$0xff]  ;;  %v851_v58 = vld [vmem:[%s493_s28] sm:$0xff]  ;;  %s1616_s2 = smov [#allocation14]  }
  0xfc   : > { %1145 = vmatpush3.bf16.msra.mxu1 %v1297_v15  ;;  %s826_s17 = sld [smem:[#allocation2 + %s825_s29]]  ;;  %v852_v63 = vld [vmem:[%s493_s28 + $0x8] sm:$0xff]  ;;  %s877_s0 = sshll.u32 %s1616_s2, 4  ;;  %s878_s0 = int_to_ptr.vmem [resolvable:$true] %s877_s0 }
  0xfd   : > { %1146 = vmatprep.subr.bf16.mxu1 %v1614_v3  ;;  %s834_s1 = sld [smem:[#allocation2 + %s833_s10]]  ;;  %v835_v45 = vstv %s814_s11  ;;  %p1224_p2 = scmp.eq.s32.totalorder %s1705_s21, 7 }
  0xfe   : > { %1127 = vmatpush3.bf16.msra.mxu0 %v1290_v5  ;;  %v836_v49 = vmul.f32 %v835_v45, %v1992_v11  ;;  %v837_v55 = vmul.f32 %v835_v45, %v1994_v12  ;;  %s2130_s3 = sld [smem:[#allocation30_spill]]  ;;  %s2131_s26 = sld [smem:[#allocation31_spill]] }
  0xff   : > { %1128 = vmatprep.subr.bf16.mxu0 %v1614_v3  ;;  %v838_v47 = vstv %s822_s24  ;;  %s1497_s13 = scalar_lea.vmem %s878_s0, 256  ;;  %p1504_p3 = scmp.lt.s32.totalorder %s878_s0, %s878_s0 }
 0x100   : > { %1147 = vmatpush3.bf16.msra.mxu1 %v1298_v16  ;;  %p1498_p12 = scmp.ne.s32.totalorder %s878_s0, %s1497_s13  ;;  %p1505_p5 = scmp.lt.s32.totalorder %s1497_s13, %s1497_s13 }
 0x101   : > { %1148 = vmatprep.subr.bf16.mxu1 %v1614_v3  ;;  %v846_v51 = vstv %s830_s30 }
 0x102   : > { %1129 = vmatpush3.bf16.msra.mxu0 %v1291_v6  ;;  %v843_v57 = vstv %s826_s17  ;;  %v847_v61 = vmul.f32 %v846_v51, %v1992_v11  ;;  %p1499_p4 = pnand %p1498_p12, %p1224_p2  ;;  %p1506_p8 = por %p1505_p5, %p1504_p3 }
 0x103   : > { %1130 = vmatprep.subr.bf16.mxu0 %v1614_v3  ;;  %v853_v59 = vstv %s834_s1 }
 0x104   : > { %1149 = vmatpush3.bf16.msra.mxu1 %v1299_v17  ;;  %v854_v1 = vmul.f32 %v853_v59, %v851_v58  ;;  %v858_v4 = vld [vmem:[%s2130_s3] sm:$0xff]  ;;  %p1500_p1 = pneg %p1499_p4 }
 0x105   : > { %1150 = vmatprep.subr.bf16.mxu1 %v1614_v3  ;;  %vm860_vm1 = vcmp.gt.f32.partialorder %v858_v4, 0.5 }
 0x106   : > { %1131 = vmatpush3.bf16.msra.mxu0 %v1292_v7  ;;  %v855_v7 = vmul.f32 %v853_v59, %v852_v63  ;;  %p1507_p7 = pnand %p1506_p8, %p1500_p1 }
 0x107   : > { %1132 = vmatprep.subr.bf16.mxu0 %v1614_v3 }
 0x108   : > { %1151 = vmatpush3.bf16.msra.mxu1 %v1300_v18 }
 0x109   : > { %1152 = vmatprep.subr.bf16.mxu1 %v1614_v3 }
 0x10a   : > { %1133 = vmatpush3.bf16.msra.mxu0 %v1293_v8  ;;  %v859_v8 = vld [vmem:[%s2130_s3 + $0x8] sm:$0xff] }
 0x10b   : > { %1134 = vmatprep.subr.bf16.mxu0 %v1614_v3  ;;  %vm861_vm2 = vcmp.gt.f32.partialorder %v859_v8, 0.5 }
 0x10c   : > { %1153 = vmatpush3.bf16.msra.mxu1 %v1301_v19 }
 0x10d   : > { %1154 = vmatprep.subr.bf16.mxu1 %v1614_v3 }
 0x10e   : > { %1135 = vmatpush3.bf16.msra.mxu0 %v1294_v9  ;;  %v862_v9 = vld [vmem:[%s2131_s26] sm:$0xff] }
 0x10f   : > { %1136 = vmatprep.subr.bf16.mxu0 %v1614_v3 }
 0x110   : > { %1155 = vmatpush3.bf16.msra.mxu1 %v1302_v20 }
 0x111   : > { %1156 = vmatprep.subr.bf16.mxu1 %v1614_v3  ;;  %v848_v3 = vmul.f32 %v846_v51, %v1994_v12  ;;  %v863_v12 = vld [vmem:[%s2131_s26 + $0x8] sm:$0xff] }
 0x112   : > { %1137 = vmatpush3.bf16.msra.mxu0 %v1295_v10 }
 0x114   : > { %1157 = vmatpush3.bf16.msra.mxu1 %v1303_v21 }
 0x115   : > { %1139 = vmatmul.mubr.bf16.vlgmr.msra.gmra.mrb[0].mxu0 %v570_v13 }
 0x1e8   : > { %v671_v23 = vpop.f32.mrb[0].mxu0 }
 0x1e9   : > { %v672_v26 = vadd.f32 %v671_v23, %v587_v22  ;;  %v1140_v27 = vpop.f32.mrb[1].mxu0 }
 0x1ea   : > { %v674_v28 = vpop.f32.mrb[2].mxu0 }
 0x1eb   : > { %v685_v29 = vadd.f32 %v1075_v24, %v672_v26  ;;  %v675_v30 = vadd.f32 %v674_v28, %v588_v25  ;;  %v1141_v31 = vpop.f32.mrb[3].mxu0 }
 0x1ed   : > { %v1076_v32 = vmul.f32 -1.442695, %v685_v29  ;;  %v686_v33 = vadd.f32 %v1075_v24, %v675_v30 }
 0x1ef   : > { %1304 = vpow2.f32 %v1076_v32  ;;  %v1077_v34 = vmul.f32 -1.442695, %v686_v33 }
 0x1f1   : > { %1306 = vpow2.f32 %v1077_v34 }
 0x1f9   : > { %v1305_v35 = vpop.eup %1304 }
 0x1fa   : > { %v693_v36 = vadd.f32 1.0, %v1305_v35 }
 0x1fb   : > { %v1307_v37 = vpop.eup %1306 }
 0x1fc   : > { %1308 = vrcp.f32 %v693_v36  ;;  %v694_v38 = vadd.f32 1.0, %v1307_v37 }
 0x1fe   : > { %1310 = vrcp.f32 %v694_v38 }
 0x206   : > { %v1309_v39 = vpop.eup %1308 }
 0x207   : > { %v699_v41 = vmul.f32 %v1309_v39, %v685_v29 }
 0x208   : > { %v1311_v40 = vpop.eup %1310 }
 0x209   : > { %v700_v42 = vmul.f32 %v1311_v40, %v686_v33 }
 0x20b   : > { %v701_v43 = vpack.c.bf16 %v700_v42, %v699_v41 }
 0x20d   : > { %1159 = vmatmul.mubr.bf16.vlgmr.msra.gmra.mrb[0].mxu1 %v701_v43 }
 0x2e0   : > { %v807_v46 = vpop.f32.mrb[0].mxu1 }
 0x2e1   : > { %v808_v48 = vadd.f32 %v1078_v44, %v807_v46  ;;  %v1160_v50 = vpop.f32.mrb[1].mxu1 }
 0x2e2   : > { %v810_v52 = vpop.f32.mrb[2].mxu1 }
 0x2e3   : > { %v839_v53 = vmul.f32 %v838_v47, %v808_v48  ;;  %v811_v54 = vadd.f32 %v1078_v44, %v810_v52  ;;  %v1161_v56 = vpop.f32.mrb[3].mxu1 }
 0x2e5   : > { %v841_v60 = vsub.f32 %v836_v49, %v839_v53  ;;  %v840_v62 = vmul.f32 %v838_v47, %v811_v54 }
 0x2e7   : > { %v844_v0 = vmul.f32 %v843_v57, %v841_v60  ;;  %v842_v2 = vsub.f32 %v837_v55, %v840_v62 }
 0x2e9   : > { %v849_v5 = vadd.f32 %v847_v61, %v844_v0  ;;  %v845_v6 = vmul.f32 %v843_v57, %v842_v2 }
 0x2eb   : > { %v856_v10 = vadd.f32 %v854_v1, %v849_v5  ;;  %v850_v11 = vadd.f32 %v848_v3, %v845_v6 }
 0x2ed   : > { %v857_v13 = vadd.f32 %v855_v7, %v850_v11  ;;  %v864_v14 = vsel %vm860_vm1, %v862_v9, %v856_v10 }
 0x2ee   : > { %866 = vst [vmem:[#allocation14] sm:$0xff] %v864_v14 }
 0x2ef   : > { %v865_v15 = vsel %vm861_vm2, %v863_v12, %v857_v13 }
 0x2f0   : > { %867 = vst [vmem:[#allocation14 + $0x8] sm:$0xff] %v865_v15 }
 0x2f1   : > { %1510 = shalt.err (!%p1507_p7)
}
 0x2f2   : > { %s2132_s24 = sld [smem:[#allocation32_spill]] }
 0x2f8   : > { %s1511_s29 = scalar_lea.hbm %s2132_s24, 256 }
 0x2f9   : > { %p1512_p6 = scmp.ne.s32.totalorder %s2132_s24, %s1511_s29  ;;  %p1517_p11 = scmp.lt.u32.totalorder %s1511_s29, %s2132_s24 }
 0x2fb   : > { %p1513_p13 = pnand %p1512_p6, %p1224_p2 }
 0x2fd   : > { %p1514_p9 = pneg %p1513_p13 }
 0x2ff   : > { %p1519_p10 = pnand %p1517_p11, %p1514_p9 }
 0x301   : > { %1522 = shalt.err (!%p1519_p10)
}
 0x302   : > { %s1617_s22 = smov 128   ;;  %s1618_s12 = smov 8  }
 0x303   : > { %1187 = dma.vmem_to_hbm [thread:$0]  (%p1224_p2), %s878_s0, 256, %s2132_s24, [#allocation4], %s1617_s22, %s1617_s22, %s1618_s12  }
 0x304   : > { %1576 = dma.done.wait (%p1224_p2), [#allocation4], 256  }
 0x305   : > { %1578 = vsyncadd (%p1224_p2), [#allocation4], 4294967040 }
 0x306 PF: > { %s25_s18 = sadd.s32 1, %s1601_s18   ;;  %s2133_s16 = sld [smem:[#allocation25_spill]] }
 0x307   : > { %p22_p0 = scmp.ge.s32.totalorder %s25_s18, 10   ;;  %s2134_s19 = sld [smem:[#allocation23_spill]] }
 0x308   : > { %s2135_s17 = sld [smem:[#allocation24_spill]]  ;;  %s2136_s13 = smov %s1585_s14 }
 0x309   : > { %s2137_s14 = smov %s1589_s15  ;;  %24 = sbr.rel (!%p22_p0) target bundleno = 15 (0xf), region = 141 }
 0x30c   : > { %s2138_s15 = smov %s2133_s16 }
 0x30d   : > { %s2139_s16 = smov %s2134_s19 }
 0x310   :  { %893 = vsyncpa [#allocation3], 1 }
 0x311   :  { %895 = vsyncpa [#allocation3 + $0x1], 1 }
 0x312   :  { %896 = vsyncpa [#allocation8], 1 }
 0x313   :  { %897 = vsyncpa [#allocation12], 1 }
 0x314   :  { %898 = vsyncpa [#allocation4], 1 }
 0x315   :  { %900 = vsyncpa [#allocation4 + $0x1], 1 }
 0x316   :  { %901 = vsyncpa [#allocation5], 1 }
 0x317   :  { %903 = vsyncpa [#allocation5 + $0x1], 1 }

</bundles_post_ra>
